<compile_context>
chip_gen: v7x
topology: tpu7x:2x2x1
jax: 0.10.0
libtpu: 0.0.40
codegen_flags: <defaults>
</compile_context>

<pallas_src>
import jax
import jax.numpy as jnp
from jax.experimental import pallas as pl
from jax.experimental.pallas import tpu as pltpu


def _ema_mixer_kernel(x_ref, d_ref, cdec_ref, w_ref, bt_ref, out_ref,
                      z_ref, carry_ref):
    """One (batch_block, seq_block) tile per grid step.

    x_ref    : VMEM (Bb, E, Tt) bf16   channel-major input tile
    d_ref    : VMEM (M, Tt, Tt) bf16   D_m^T[k,t] = s_m * a_m^(t-k) (t>=k), resident
    cdec_ref : VMEM (M, Tt)     f32    a_m^(tau+1) over local positions, resident
    w_ref    : VMEM (E, M*E)    bf16   proj weight, (m, e_in)-major columns, resident
    bt_ref   : VMEM (E, Tt)     f32    projected bias_seq + proj bias (batch-invariant)
    out_ref  : VMEM (Bb, E, Tt) f32    channel-major output tile
    z_ref    : VMEM scratch (Bb, M*E, Tt) bf16   staged EMA streams
    carry_ref: VMEM scratch (Bb*E, M) f32        EMA signal state at end of prev tile
    """
    Bb, E, Tt = x_ref.shape
    M = d_ref.shape[0]

    # Reset the cross-tile carry at the start of every sequence.
    @pl.when(pl.program_id(1) == 0)
    def _():
        carry_ref[...] = jnp.zeros_like(carry_ref)

    # Packed channel-major input: rows = (batch, embed), lanes = time.
    # Leading-dim merge is relayout-free.
    xp = x_ref[...].reshape(Bb * E, Tt)                       # bf16

    # --- M EMA streams: one (Bb*E, Tt) @ (Tt, Tt) bf16 MXU matmul each.
    # Static loop; each iteration's results go straight to VMEM refs, so live
    # ranges stay bounded (no vreg-resident concat).
    for m in range(M):
        z = jnp.dot(xp, d_ref[m], preferred_element_type=jnp.float32)
        # Contribution of all previous sequence tiles: carry * a^(tau+1).
        z = z + carry_ref[:, m:m + 1] * cdec_ref[m:m + 1, :]
        # Signal state handed to the next sequence tile (f32, no bias).
        carry_ref[:, m:m + 1] = z[:, Tt - 1:Tt]
        z_ref[:, m * E:(m + 1) * E, :] = z.astype(z_ref.dtype).reshape(Bb, E, Tt)

    # --- projection: (E, M*E) @ (M*E, Tt) per batch row, bias folded in.
    bterm = bt_ref[...]                                        # (E, Tt) f32
    w = w_ref[...]                                             # (E, M*E) bf16
    for b in range(Bb):                                        # Bb static, small
        mix = jnp.dot(w, z_ref[b], preferred_element_type=jnp.float32)
        out_ref[b] = (mix + bterm).astype(out_ref.dtype)


def _pick_t_tile(T):
    if T <= 256:
        return T
    for cand in (256, 128):
        if T % cand == 0:
            return cand
    return T  # fallback: single sequence tile


def ema_mixer_forward(x, params, *, t_tile=None, b_tile=None):
    """Pallas forward of EMAMixer. x: (B, T, E) -> (B, T, E)."""
    B, T, E = x.shape
    M = params["alpha_logits"].shape[0]

    # ---- tile selection -----------------------------------------------------
    if t_tile is None:
        t_tile = _pick_t_tile(T)
    assert t_tile == T or (t_tile % 128 == 0 and T % t_tile == 0), \
        "t_tile must equal T or be a multiple of 128 that divides T"

    def vmem_est(bt):
        lane = max(t_tile, 128)
        x_blk = bt * E * lane * 2 * 2           # bf16 input block, double-buffered
        o_blk = bt * E * lane * 4 * 2           # f32 output block
        bt_blk = E * lane * 4 * 2               # bias-term block
        d_res = M * t_tile * lane * 2 * 2       # resident decay operators (bf16)
        w_res = E * M * E * 2 * 2               # resident packed proj weight (bf16)
        cd_res = M * lane * 4 * 2               # resident carry decay
        z_scr = bt * M * E * lane * 2           # bf16 z slab
        c_scr = bt * E * 128 * 4                # carry (lane-padded)
        return x_blk + o_blk + bt_blk + d_res + w_res + cd_res + z_scr + c_scr

    if b_tile is None:
        divisors = [d for d in range(1, B + 1) if B % d == 0]
        ok = [d for d in divisors if vmem_est(d) <= 24 * 1024 * 1024] or [1]
        even_ge2 = [d for d in ok if (B // d) >= 2 and (B // d) % 2 == 0]
        ge2 = [d for d in ok if (B // d) >= 2]
        pool = even_ge2 or ge2 or ok
        b_tile = max(pool)
    assert B % b_tile == 0

    # ---- scalar EMA coefficients (tiny, f32) --------------------------------
    a = jax.nn.sigmoid(params["alpha_logits"].astype(jnp.float32))       # (M,)
    s = 1.0 - a
    loga = jnp.log(a)

    # ---- precomputed transposed decay operators: D^T[m,k,t] = s a^(t-k), t>=k
    k_idx = jnp.arange(t_tile, dtype=jnp.int32)[:, None]
    t_idx = jnp.arange(t_tile, dtype=jnp.int32)[None, :]
    dt = (t_idx - k_idx).astype(jnp.float32)                             # (Tt, Tt)
    causal = (dt >= 0.0)[None]
    dT = jnp.where(
        causal,
        s[:, None, None] * jnp.exp(loga[:, None, None] * jnp.maximum(dt, 0.0)[None]),
        0.0).astype(jnp.bfloat16)                                         # (M, Tt, Tt)

    # carry decay over local positions: a^(tau+1), f32 (multiplies f32 carry)
    tau = jnp.arange(t_tile, dtype=jnp.float32)[None, :]
    cdec = jnp.exp(loga[:, None] * (tau + 1.0))                           # (M, Tt)

    # ---- projection weight, repacked to (m, e_in)-major columns, bf16 -------
    W = params["proj_w"].astype(jnp.float32)                              # (E, E*M)
    W3 = W.reshape(E, E, M)                                               # [e_out, e_in, m]
    Wp = jnp.transpose(W3, (0, 2, 1)).reshape(E, M * E).astype(jnp.bfloat16)

    # ---- batch-invariant bias, folded through the projection (f32, exact) ---
    tg = jnp.arange(T, dtype=jnp.float32)[None, :]
    bias_seq = (params["bias"].astype(jnp.float32)[:, None]
                * (1.0 - jnp.exp(loga[:, None] * (tg + 1.0)))
                / jnp.maximum(s, 1e-8)[:, None])                          # (M, T)
    bterm = W3.sum(axis=1) @ bias_seq + params["proj_b"].astype(jnp.float32)[:, None]  # (E, T)

    # ---- channel-major bf16 input -------------------------------------------
    x_cm = jnp.swapaxes(x, 1, 2).astype(jnp.bfloat16)                     # (B, E, T)

    grid = (B // b_tile, T // t_tile)

    # ---- cost estimate + VMEM budget ----------------------------------------
    flops = 2.0 * B * E * T * t_tile * M + 2.0 * B * T * E * M * E
    bytes_acc = (2 * B * E * T + 4 * B * E * T + 2 * M * t_tile * t_tile
                 + 2 * E * M * E + 4 * E * T + 4 * M * t_tile)
    est = vmem_est(b_tile)
    vlim = None
    if est > 30 * 1024 * 1024:
        # never request the full 64 MiB physical VMEM of v7x; leave headroom.
        vlim = min(int(est * 1.25), 48 * 1024 * 1024)

    out_cm = pl.pallas_call(
        _ema_mixer_kernel,
        out_shape=jax.ShapeDtypeStruct((B, E, T), jnp.float32),
        grid_spec=pltpu.PrefetchScalarGridSpec(
            num_scalar_prefetch=0,
            grid=grid,
            in_specs=[
                pl.BlockSpec((b_tile, E, t_tile), lambda b, t: (b, 0, t)),   # x (bf16)
                pl.BlockSpec((M, t_tile, t_tile), lambda b, t: (0, 0, 0)),   # D^T resident
                pl.BlockSpec((M, t_tile), lambda b, t: (0, 0)),              # carry decay
                pl.BlockSpec((E, M * E), lambda b, t: (0, 0)),               # proj W packed
                pl.BlockSpec((E, t_tile), lambda b, t: (0, t)),              # bias term
            ],
            out_specs=pl.BlockSpec((b_tile, E, t_tile), lambda b, t: (b, 0, t)),
            scratch_shapes=[
                pltpu.VMEM((b_tile, M * E, t_tile), jnp.bfloat16),   # staged EMA streams
                pltpu.VMEM((b_tile * E, M), jnp.float32),            # cross-tile carry
            ],
        ),
        compiler_params=pltpu.CompilerParams(
            dimension_semantics=("parallel", "arbitrary"),
            vmem_limit_bytes=vlim),
        cost_estimate=pl.CostEstimate(
            flops=int(flops), transcendentals=0, bytes_accessed=int(bytes_acc)),
    )(x_cm, dT, cdec, Wp, bterm)

    return jnp.swapaxes(out_cm, 1, 2).astype(x.dtype)


def ema_mixer_ref(x, params):
    """Pure-JAX mirror of the PyTorch EMAMixer.forward (correctness check).

    NOTE: uses the exp(-log(a)*t) factorization like the PyTorch module; only
    valid for moderate T (tests use T <= 256).
    """
    B, T, E = x.shape
    M = params["alpha_logits"].shape[0]
    a = jax.nn.sigmoid(params["alpha_logits"])
    s = 1.0 - a
    xt = jnp.swapaxes(x, 1, 2)                              # (B, E, T)
    t = jnp.arange(T, dtype=x.dtype)[None, :]
    loga = jnp.log(a)[:, None]
    a_neg_pow = jnp.exp(-loga * t)
    a_pos_pow = jnp.exp(loga * t)
    weighted = xt[:, None] * s.reshape(1, M, 1, 1) * a_neg_pow.reshape(1, M, 1, T)
    z = jnp.cumsum(weighted, axis=-1)
    y = z * a_pos_pow.reshape(1, M, 1, T)
    a_t1 = a_pos_pow * a[:, None]
    denom = jnp.maximum(s, 1e-8)
    bias_seq = params["bias"][:, None] * (1.0 - a_t1) / denom[:, None]
    y = y + bias_seq.reshape(1, M, 1, T)
    y = jnp.transpose(y, (0, 3, 2, 1)).reshape(B, T, E * M)
    return y @ params["proj_w"].T + params["proj_b"]


def init_params(key, E, M):
    kw, kb, ka, kbias = jax.random.split(key, 4)
    bound = 1.0 / jnp.sqrt(jnp.float32(E * M))
    proj_w = jax.random.uniform(kw, (E, E * M), jnp.float32, -bound, bound)
    proj_b = jax.random.uniform(kb, (E,), jnp.float32, -bound, bound)
    init_alpha = jnp.float32(0.9)
    inv_sig = jnp.log(init_alpha / (1.0 - init_alpha))
    return {
        "alpha_logits": inv_sig + 0.3 * jax.random.normal(ka, (M,), jnp.float32),
        "bias": 0.1 * jax.random.normal(kbias, (M,), jnp.float32),
        "proj_w": proj_w,
        "proj_b": proj_b,
    }


# TODO(synk): EMAMixer.step() (single-token decode with cached (B, M, E) state)
# is not kernelized here; only the full-sequence forward path is implemented.

if __name__ == "__main__":
    key = jax.random.PRNGKey(0)
    k1, k2, k3, k4 = jax.random.split(key, 4)

    fwd = jax.jit(ema_mixer_forward, static_argnames=("t_tile", "b_tile"))

    # bf16 MXU operands with f32 accumulation -> ~1e-3..1e-2 relative error;
    # tolerances relaxed accordingly (deliberate, per perf review).
    RTOL = ATOL = 4e-2

    # Test 1: module-sized small shapes, single sequence tile (t_tile = T = 8).
    B, T, E, M = 2, 8, 32, 4
    x = jax.random.normal(k1, (B, T, E), jnp.float32)
    params = init_params(k2, E, M)
    out = jax.block_until_ready(fwd(x, params))
    ref = ema_mixer_ref(x, params)
    assert out.shape == (B, T, E)
    err1 = float(jnp.max(jnp.abs(out - ref)))
    assert jnp.allclose(out, ref, rtol=RTOL, atol=ATOL), f"test1 max abs err {err1}"

    # Test 2: exercises sequence tiling (cross-tile EMA carry, T=256 / t_tile=128
    # -> 2 sequential seq tiles) and batch blocking (B=4 -> b_tile=2, 2 parallel
    # batch blocks).
    B2, T2 = 4, 256
    x2 = jax.random.normal(k3, (B2, T2, E), jnp.float32)
    params2 = init_params(k4, E, M)
    out2 = jax.block_until_ready(fwd(x2, params2, t_tile=128))
    ref2 = ema_mixer_ref(x2, params2)
    err2 = float(jnp.max(jnp.abs(out2 - ref2)))
    assert jnp.allclose(out2, ref2, rtol=RTOL, atol=ATOL), f"test2 max abs err {err2}"

    print("KERNEL_OK")
</pallas_src>

<mosaic_0001>
module attributes {stable_mosaic.version = 11 : i64} {
  func.func @_ema_mixer_kernel(%arg0: i32, %arg1: i32, %arg2: memref<1x32x8xbf16, #tpu.memory_space<vmem>>, %arg3: memref<4x8x8xbf16, #tpu.memory_space<vmem>>, %arg4: memref<4x8xf32, #tpu.memory_space<vmem>>, %arg5: memref<32x128xbf16, #tpu.memory_space<vmem>>, %arg6: memref<32x8xf32, #tpu.memory_space<vmem>>, %arg7: memref<1x32x8xf32, #tpu.memory_space<vmem>>, %arg8: memref<1x128x8xbf16, #tpu.memory_space<vmem>>, %arg9: memref<32x4xf32, #tpu.memory_space<vmem>>) attributes {dimension_semantics = [#tpu.dimension_semantics<parallel>, #tpu.dimension_semantics<arbitrary>], iteration_bounds = array<i64: 2, 1>, scalar_prefetch = 0 : i64, scratch_operands = 2 : i64, tpu.core_type = #tpu.core_type<tc>, window_params = [{transform_indices = @transform_0, window_bounds = array<i64: 1, 32, 8>}, {pipeline_mode = #tpu.pipeline_mode<synchronous>, transform_indices = @transform_1, window_bounds = array<i64: 4, 8, 8>}, {pipeline_mode = #tpu.pipeline_mode<synchronous>, transform_indices = @transform_2, window_bounds = array<i64: 4, 8>}, {pipeline_mode = #tpu.pipeline_mode<synchronous>, transform_indices = @transform_3, window_bounds = array<i64: 32, 128>}, {transform_indices = @transform_4, window_bounds = array<i64: 32, 8>}, {transform_indices = @transform_5, window_bounds = array<i64: 1, 32, 8>}]} {
    %c0_i32 = arith.constant 0 : i32
    %0 = arith.cmpi eq, %arg1, %c0_i32 : i32
    %1 = arith.extui %0 : i1 to i32
    %c0_i32_0 = arith.constant 0 : i32
    %2 = arith.cmpi ne, %1, %c0_i32_0 : i32
    scf.if %2 {
      %cst_59 = arith.constant 0.000000e+00 : f32
      %70 = vector.broadcast %cst_59 : f32 to vector<32x4xf32>
      %c0_60 = arith.constant 0 : index
      %c0_61 = arith.constant 0 : index
      %71 = vector.load %arg9[%c0_60, %c0_61] : memref<32x4xf32, #tpu.memory_space<vmem>>, vector<32x4xf32>
      tpu.vector_store %arg9[%c0_60, %c0_61], %70 {strides = array<i32>} : memref<32x4xf32, #tpu.memory_space<vmem>>, vector<32x4xf32>,
    } else {
    }
    %c0 = arith.constant 0 : index
    %c0_1 = arith.constant 0 : index
    %c0_2 = arith.constant 0 : index
    %3 = vector.load %arg2[%c0, %c0_1, %c0_2] : memref<1x32x8xbf16, #tpu.memory_space<vmem>>, vector<1x32x8xbf16>
    %4 = vector.shape_cast %3 : vector<1x32x8xbf16> to vector<32x8xbf16>
    %c0_3 = arith.constant 0 : index
    %c0_4 = arith.constant 0 : index
    %c0_5 = arith.constant 0 : index
    %5 = vector.load %arg3[%c0_3, %c0_4, %c0_5] : memref<4x8x8xbf16, #tpu.memory_space<vmem>>, vector<1x8x8xbf16>
    %6 = vector.shape_cast %5 : vector<1x8x8xbf16> to vector<8x8xbf16>
    %cst = arith.constant dense<0.000000e+00> : vector<32x8xf32>
    %7 = tpu.matmul %4, %6, %cst {dimension_numbers = #tpu.dot_dimension_numbers<[1], [0], [0], [1], [0, 0, 1, 1], [], []>} : vector<32x8xbf16>, vector<8x8xbf16>, vector<32x8xf32> -> vector<32x8xf32>
    %c0_6 = arith.constant 0 : index
    %c0_7 = arith.constant 0 : index
    %8 = vector.load %arg9[%c0_6, %c0_7] : memref<32x4xf32, #tpu.memory_space<vmem>>, vector<32x1xf32>
    %c0_8 = arith.constant 0 : index
    %c0_9 = arith.constant 0 : index
    %9 = vector.load %arg4[%c0_8, %c0_9] : memref<4x8xf32, #tpu.memory_space<vmem>>, vector<1x8xf32>
    %10 = vector.broadcast %8 : vector<32x1xf32> to vector<32x8xf32>
    %11 = vector.broadcast %9 : vector<1x8xf32> to vector<32x8xf32>
    %12 = arith.mulf %10, %11 : vector<32x8xf32>
    %13 = arith.addf %7, %12 : vector<32x8xf32>
    %14 = vector.extract_strided_slice %13 {offsets = [0, 7], sizes = [32, 1], strides = [1, 1]} : vector<32x8xf32> to vector<32x1xf32>
    %c0_10 = arith.constant 0 : index
    %c0_11 = arith.constant 0 : index
    %15 = vector.load %arg9[%c0_10, %c0_11] : memref<32x4xf32, #tpu.memory_space<vmem>>, vector<32x1xf32>
    tpu.vector_store %arg9[%c0_10, %c0_11], %14 {strides = array<i32>} : memref<32x4xf32, #tpu.memory_space<vmem>>, vector<32x1xf32>,
    %16 = arith.truncf %13 : vector<32x8xf32> to vector<32x8xbf16>
    %17 = vector.shape_cast %16 : vector<32x8xbf16> to vector<1x32x8xbf16>
    %c0_12 = arith.constant 0 : index
    %c0_13 = arith.constant 0 : index
    %c0_14 = arith.constant 0 : index
    %18 = vector.load %arg8[%c0_12, %c0_13, %c0_14] : memref<1x128x8xbf16, #tpu.memory_space<vmem>>, vector<1x32x8xbf16>
    tpu.vector_store %arg8[%c0_12, %c0_13, %c0_14], %17 {strides = array<i32>} : memref<1x128x8xbf16, #tpu.memory_space<vmem>>, vector<1x32x8xbf16>,
    %c1 = arith.constant 1 : index
    %c0_15 = arith.constant 0 : index
    %c0_16 = arith.constant 0 : index
    %19 = vector.load %arg3[%c1, %c0_15, %c0_16] : memref<4x8x8xbf16, #tpu.memory_space<vmem>>, vector<1x8x8xbf16>
    %20 = vector.shape_cast %19 : vector<1x8x8xbf16> to vector<8x8xbf16>
    %cst_17 = arith.constant dense<0.000000e+00> : vector<32x8xf32>
    %21 = tpu.matmul %4, %20, %cst_17 {dimension_numbers = #tpu.dot_dimension_numbers<[1], [0], [0], [1], [0, 0, 1, 1], [], []>} : vector<32x8xbf16>, vector<8x8xbf16>, vector<32x8xf32> -> vector<32x8xf32>
    %c0_18 = arith.constant 0 : index
    %c1_19 = arith.constant 1 : index
    %22 = vector.load %arg9[%c0_18, %c1_19] : memref<32x4xf32, #tpu.memory_space<vmem>>, vector<32x1xf32>
    %c1_20 = arith.constant 1 : index
    %c0_21 = arith.constant 0 : index
    %23 = vector.load %arg4[%c1_20, %c0_21] : memref<4x8xf32, #tpu.memory_space<vmem>>, vector<1x8xf32>
    %24 = vector.broadcast %22 : vector<32x1xf32> to vector<32x8xf32>
    %25 = vector.broadcast %23 : vector<1x8xf32> to vector<32x8xf32>
    %26 = arith.mulf %24, %25 : vector<32x8xf32>
    %27 = arith.addf %21, %26 : vector<32x8xf32>
    %28 = vector.extract_strided_slice %27 {offsets = [0, 7], sizes = [32, 1], strides = [1, 1]} : vector<32x8xf32> to vector<32x1xf32>
    %c0_22 = arith.constant 0 : index
    %c1_23 = arith.constant 1 : index
    %29 = vector.load %arg9[%c0_22, %c1_23] : memref<32x4xf32, #tpu.memory_space<vmem>>, vector<32x1xf32>
    tpu.vector_store %arg9[%c0_22, %c1_23], %28 {strides = array<i32>} : memref<32x4xf32, #tpu.memory_space<vmem>>, vector<32x1xf32>,
    %30 = arith.truncf %27 : vector<32x8xf32> to vector<32x8xbf16>
    %31 = vector.shape_cast %30 : vector<32x8xbf16> to vector<1x32x8xbf16>
    %c0_24 = arith.constant 0 : index
    %c32 = arith.constant 32 : index
    %c0_25 = arith.constant 0 : index
    %32 = vector.load %arg8[%c0_24, %c32, %c0_25] : memref<1x128x8xbf16, #tpu.memory_space<vmem>>, vector<1x32x8xbf16>
    tpu.vector_store %arg8[%c0_24, %c32, %c0_25], %31 {strides = array<i32>} : memref<1x128x8xbf16, #tpu.memory_space<vmem>>, vector<1x32x8xbf16>,
    %c2 = arith.constant 2 : index
    %c0_26 = arith.constant 0 : index
    %c0_27 = arith.constant 0 : index
    %33 = vector.load %arg3[%c2, %c0_26, %c0_27] : memref<4x8x8xbf16, #tpu.memory_space<vmem>>, vector<1x8x8xbf16>
    %34 = vector.shape_cast %33 : vector<1x8x8xbf16> to vector<8x8xbf16>
    %cst_28 = arith.constant dense<0.000000e+00> : vector<32x8xf32>
    %35 = tpu.matmul %4, %34, %cst_28 {dimension_numbers = #tpu.dot_dimension_numbers<[1], [0], [0], [1], [0, 0, 1, 1], [], []>} : vector<32x8xbf16>, vector<8x8xbf16>, vector<32x8xf32> -> vector<32x8xf32>
    %c0_29 = arith.constant 0 : index
    %c2_30 = arith.constant 2 : index
    %36 = vector.load %arg9[%c0_29, %c2_30] : memref<32x4xf32, #tpu.memory_space<vmem>>, vector<32x1xf32>
    %c2_31 = arith.constant 2 : index
    %c0_32 = arith.constant 0 : index
    %37 = vector.load %arg4[%c2_31, %c0_32] : memref<4x8xf32, #tpu.memory_space<vmem>>, vector<1x8xf32>
    %38 = vector.broadcast %36 : vector<32x1xf32> to vector<32x8xf32>
    %39 = vector.broadcast %37 : vector<1x8xf32> to vector<32x8xf32>
    %40 = arith.mulf %38, %39 : vector<32x8xf32>
    %41 = arith.addf %35, %40 : vector<32x8xf32>
    %42 = vector.extract_strided_slice %41 {offsets = [0, 7], sizes = [32, 1], strides = [1, 1]} : vector<32x8xf32> to vector<32x1xf32>
    %c0_33 = arith.constant 0 : index
    %c2_34 = arith.constant 2 : index
    %43 = vector.load %arg9[%c0_33, %c2_34] : memref<32x4xf32, #tpu.memory_space<vmem>>, vector<32x1xf32>
    tpu.vector_store %arg9[%c0_33, %c2_34], %42 {strides = array<i32>} : memref<32x4xf32, #tpu.memory_space<vmem>>, vector<32x1xf32>,
    %44 = arith.truncf %41 : vector<32x8xf32> to vector<32x8xbf16>
    %45 = vector.shape_cast %44 : vector<32x8xbf16> to vector<1x32x8xbf16>
    %c0_35 = arith.constant 0 : index
    %c64 = arith.constant 64 : index
    %c0_36 = arith.constant 0 : index
    %46 = vector.load %arg8[%c0_35, %c64, %c0_36] : memref<1x128x8xbf16, #tpu.memory_space<vmem>>, vector<1x32x8xbf16>
    tpu.vector_store %arg8[%c0_35, %c64, %c0_36], %45 {strides = array<i32>} : memref<1x128x8xbf16, #tpu.memory_space<vmem>>, vector<1x32x8xbf16>,
    %c3 = arith.constant 3 : index
    %c0_37 = arith.constant 0 : index
    %c0_38 = arith.constant 0 : index
    %47 = vector.load %arg3[%c3, %c0_37, %c0_38] : memref<4x8x8xbf16, #tpu.memory_space<vmem>>, vector<1x8x8xbf16>
    %48 = vector.shape_cast %47 : vector<1x8x8xbf16> to vector<8x8xbf16>
    %cst_39 = arith.constant dense<0.000000e+00> : vector<32x8xf32>
    %49 = tpu.matmul %4, %48, %cst_39 {dimension_numbers = #tpu.dot_dimension_numbers<[1], [0], [0], [1], [0, 0, 1, 1], [], []>} : vector<32x8xbf16>, vector<8x8xbf16>, vector<32x8xf32> -> vector<32x8xf32>
    %c0_40 = arith.constant 0 : index
    %c3_41 = arith.constant 3 : index
    %50 = vector.load %arg9[%c0_40, %c3_41] : memref<32x4xf32, #tpu.memory_space<vmem>>, vector<32x1xf32>
    %c3_42 = arith.constant 3 : index
    %c0_43 = arith.constant 0 : index
    %51 = vector.load %arg4[%c3_42, %c0_43] : memref<4x8xf32, #tpu.memory_space<vmem>>, vector<1x8xf32>
    %52 = vector.broadcast %50 : vector<32x1xf32> to vector<32x8xf32>
    %53 = vector.broadcast %51 : vector<1x8xf32> to vector<32x8xf32>
    %54 = arith.mulf %52, %53 : vector<32x8xf32>
    %55 = arith.addf %49, %54 : vector<32x8xf32>
    %56 = vector.extract_strided_slice %55 {offsets = [0, 7], sizes = [32, 1], strides = [1, 1]} : vector<32x8xf32> to vector<32x1xf32>
    %c0_44 = arith.constant 0 : index
    %c3_45 = arith.constant 3 : index
    %57 = vector.load %arg9[%c0_44, %c3_45] : memref<32x4xf32, #tpu.memory_space<vmem>>, vector<32x1xf32>
    tpu.vector_store %arg9[%c0_44, %c3_45], %56 {strides = array<i32>} : memref<32x4xf32, #tpu.memory_space<vmem>>, vector<32x1xf32>,
    %58 = arith.truncf %55 : vector<32x8xf32> to vector<32x8xbf16>
    %59 = vector.shape_cast %58 : vector<32x8xbf16> to vector<1x32x8xbf16>
    %c0_46 = arith.constant 0 : index
    %c96 = arith.constant 96 : index
    %c0_47 = arith.constant 0 : index
    %60 = vector.load %arg8[%c0_46, %c96, %c0_47] : memref<1x128x8xbf16, #tpu.memory_space<vmem>>, vector<1x32x8xbf16>
    tpu.vector_store %arg8[%c0_46, %c96, %c0_47], %59 {strides = array<i32>} : memref<1x128x8xbf16, #tpu.memory_space<vmem>>, vector<1x32x8xbf16>,
    %c0_48 = arith.constant 0 : index
    %c0_49 = arith.constant 0 : index
    %61 = vector.load %arg6[%c0_48, %c0_49] : memref<32x8xf32, #tpu.memory_space<vmem>>, vector<32x8xf32>
    %c0_50 = arith.constant 0 : index
    %c0_51 = arith.constant 0 : index
    %62 = vector.load %arg5[%c0_50, %c0_51] : memref<32x128xbf16, #tpu.memory_space<vmem>>, vector<32x128xbf16>
    %c0_52 = arith.constant 0 : index
    %c0_53 = arith.constant 0 : index
    %c0_54 = arith.constant 0 : index
    %63 = vector.load %arg8[%c0_52, %c0_53, %c0_54] : memref<1x128x8xbf16, #tpu.memory_space<vmem>>, vector<1x128x8xbf16>
    %64 = vector.shape_cast %63 : vector<1x128x8xbf16> to vector<128x8xbf16>
    %cst_55 = arith.constant dense<0.000000e+00> : vector<32x8xf32>
    %65 = tpu.matmul %62, %64, %cst_55 {dimension_numbers = #tpu.dot_dimension_numbers<[1], [0], [0], [1], [0, 0, 1, 1], [], []>} : vector<32x128xbf16>, vector<128x8xbf16>, vector<32x8xf32> -> vector<32x8xf32>
    %66 = arith.addf %65, %61 : vector<32x8xf32>
    %c0_56 = arith.constant 0 : index
    %c0_57 = arith.constant 0 : index
    %c0_58 = arith.constant 0 : index
    %67 = vector.load %arg7[%c0_56, %c0_57, %c0_58] : memref<1x32x8xf32, #tpu.memory_space<vmem>>, vector<1x32x8xf32>
    %68 = vector.shape_cast %67 : vector<1x32x8xf32> to vector<32x8xf32>
    %69 = vector.shape_cast %66 : vector<32x8xf32> to vector<1x32x8xf32>
    tpu.vector_store %arg7[%c0_56, %c0_57, %c0_58], %69 {strides = array<i32>} : memref<1x32x8xf32, #tpu.memory_space<vmem>>, vector<1x32x8xf32>,
    return
  }
  func.func @transform_0(%arg0: i32, %arg1: i32) -> (i32, i32, i32) {
    %c0_i32 = arith.constant 0 : i32
    %c0_i32_0 = arith.constant 0 : i32
    return %arg0, %c0_i32, %arg1 : i32, i32, i32
  }
  func.func @transform_1(%arg0: i32, %arg1: i32) -> (i32, i32, i32) {
    %c0_i32 = arith.constant 0 : i32
    %c0_i32_0 = arith.constant 0 : i32
    %c0_i32_1 = arith.constant 0 : i32
    %c0_i32_2 = arith.constant 0 : i32
    return %c0_i32, %c0_i32_0, %c0_i32_1 : i32, i32, i32
  }
  func.func @transform_2(%arg0: i32, %arg1: i32) -> (i32, i32) {
    %c0_i32 = arith.constant 0 : i32
    %c0_i32_0 = arith.constant 0 : i32
    %c0_i32_1 = arith.constant 0 : i32
    return %c0_i32, %c0_i32_0 : i32, i32
  }
  func.func @transform_3(%arg0: i32, %arg1: i32) -> (i32, i32) {
    %c0_i32 = arith.constant 0 : i32
    %c0_i32_0 = arith.constant 0 : i32
    %c0_i32_1 = arith.constant 0 : i32
    return %c0_i32, %c0_i32_0 : i32, i32
  }
  func.func @transform_4(%arg0: i32, %arg1: i32) -> (i32, i32) {
    %c0_i32 = arith.constant 0 : i32
    %c0_i32_0 = arith.constant 0 : i32
    return %c0_i32, %arg1 : i32, i32
  }
  func.func @transform_5(%arg0: i32, %arg1: i32) -> (i32, i32, i32) {
    %c0_i32 = arith.constant 0 : i32
    %c0_i32_0 = arith.constant 0 : i32
    return %arg0, %c0_i32, %arg1 : i32, i32, i32
  }
}

</mosaic_0001>

<bundles_post_ra>
// kernel: ema_mixer_forward.1
= control target key start
LH: loop header
LB: loop body
LE: loop exit
PB: predicated region body
PF: predicated region fallthrough
CT: control target
= control target key end

     0   :  { %s1143_s18 = smov 0   ;;  %s1145_s19 = smov 0   ;;  %s1262_s0 = inlined_call_operand.vmem [shape: bf16[2,32,8], index: 0, kind: input, shape index: {}]   ;;  %s1263_s1 = inlined_call_operand.vmem [shape: bf16[4,8,8], index: 1, kind: input, shape index: {}]   ;;  %s1264_s2 = inlined_call_operand.vmem [shape: f32[4,8], index: 2, kind: input, shape index: {}]   ;;  %s1265_s3 = inlined_call_operand.vmem [shape: bf16[32,128], index: 3, kind: input, shape index: {}]   ;;  %s1266_s4 = inlined_call_operand.vmem [shape: f32[32,8], index: 4, kind: input, shape index: {}]   ;;  %s1267_s5 = inlined_call_operand.vmem [shape: f32[2,32,8], index: 5, kind: output, shape index: {}]  }
   0x1   :  { %s1147_s20 = smov 0  }
   0x2 LB: > { %s27_s21 = sadd.s32 1, %s1098_s19  ;;  %p937_p0 = scmp.ge.s32.totalorder %s1102_s20, 1  ;;  %s1102_s20 = sphi %s1147_s20, %s15_s20   ;;  %s1098_s19 = sphi %s1145_s19, %s1269_s19   ;;  %s1094_s18 = sphi %s1143_s18, %s1268_s18  }
   0x3   : > { %p29_p1 = scmp.ge.s32.totalorder %s27_s21, 2  ;;  %p215_p2 = scmp.lt.s32.totalorder %s1102_s20, 3 }
   0x5   : > { %s1271_s21 = smov (%p29_p1, %s27_s21), 0  ;;  %p216_p3 = pnand %p937_p0, %p215_p2 }
   0x6   : > { %v287_v0 = vld [vmem:[%s1263_s1] sm:$0xf] (!%p216_p3)  ;;  %vm338_vm0 = vcmask (!%p216_p3), 1043456   ;;  %p253_p4 = scmp.lt.s32.totalorder (!%p216_p3), %s1094_s18, 1  ;;  %v1104_v2 = vmov (!%p216_p3), 0   ;;  %vm278_vm1 = vcmask (!%p216_p3), 31744  }
   0x7   : > { %219 = sbr.rel (%p216_p3) target bundleno = 1241 (0x4d9), region = 40  ;;  %1031 = vmatprep.subr.msk.bf16.mxu1 (!%p216_p3), %vm338_vm0, %v287_v0  ;;  %v340_v1 = vsel (!%p216_p3), %vm338_vm0, %v287_v0, 0  ;;  %1068 = vset.pattern.permute.xlu0 (!%p216_p3), %v1104_v2  ;;  %v1105_v3 = vmov (!%p216_p3), 0.0   ;;  %vm331_vm2 = vcmask (!%p216_p3), 64512   ;;  %v947_v10 = vld [vmem:[%s1263_s1 + $0x4] sm:$0xf] (!%p216_p3) }
   0x8   : > { %988 = vmatpush3.bf16.msra.mxu1 (!%p216_p3), %v340_v1  ;;  %279 = vst.msk [vmem:[#allocation3] sm:$0xff] (!%p216_p3), %vm278_vm1, %v1105_v3  ;;  %280 = vst.msk [vmem:[#allocation3 + $0x8] sm:$0xff] (!%p216_p3), %vm278_vm1, %v1105_v3  ;;  %1069 = vset.pattern.permute.xlu1 (!%p216_p3), %v1104_v2  ;;  %v452_v11 = vsel (!%p216_p3), %vm338_vm0, %v947_v10, 0  ;;  %v942_v14 = vld [vmem:[%s1264_s2] ss:$0 sm:$0xff] (!%p216_p3)  ;;  %v1106_v16 = vmov (!%p216_p3), 1  }
   0x9   : > { %281 = vst.msk [vmem:[#allocation3 + $0x10] sm:$0xff] (!%p216_p3), %vm278_vm1, %v1105_v3  ;;  %282 = vst.msk [vmem:[#allocation3 + $0x18] sm:$0xff] (!%p216_p3), %vm278_vm1, %v1105_v3  ;;  %1032 = vmatprep.subr.msk.bf16.mxu1 (!%p216_p3), %vm338_vm0, %v947_v10  ;;  %s1107_s7 = smov (!%p216_p3), 121   ;;  %vm407_vm3 = vcmask (!%p216_p3), 7168   ;;  %v951_v46 = vld [vmem:[%s1263_s1 + $0x8] sm:$0xf] (!%p216_p3) }
   0xa   : > { %v564_v47 = vsel (!%p216_p3), %vm338_vm0, %v951_v46, 0  ;;  %v948_v48 = vld [vmem:[%s1264_s2 + $0x1] ss:$0 sm:$0xff] (!%p216_p3)  ;;  %v1108_v49 = vmov (!%p216_p3), 2   ;;  %s1109_s12 = smov (!%p216_p3), 122   ;;  %vm519_vm4 = vcmask (!%p216_p3), 15368  }
   0xb   : > { %s1111_s17 = smov (!%p216_p3), 123   ;;  %vm631_vm5 = vcmask (!%p216_p3), 23568   ;;  %s1112_s26 = smov (!%p216_p3), 124   ;;  %vm743_vm6 = vcmask (!%p216_p3), 31768  }
   0xe   : > { %s1273_s18 = smov (!%p253_p4, %s1094_s18), 1 }
   0xf   : > { %s963_s24 = sshll.u32 %s1273_s18, 4  ;;  %v288_v6 = vld [vmem:[#allocation3] sm:$0xff]  ;;  %v289_v8 = vld [vmem:[#allocation3 + $0x8] sm:$0xff]  ;;  %s964_s29 = sshll.u32 %s1273_s18, 5 }
  0x10   : > { %s260_s27 = scalar_lea.vmem %s1262_s0, %s963_s24  ;;  %v290_v7 = vld [vmem:[#allocation3 + $0x10] sm:$0xff]  ;;  %295 = vperm.xlu0 %1068, %v288_v6   ;;  %v291_v9 = vld [vmem:[#allocation3 + $0x18] sm:$0xff]  ;;  %s272_s11 = scalar_lea.vmem %s1267_s5, %s964_s29 }
  0x11   : > { %v1172_v4 = vld [vmem:[%s260_s27] sm:$0xff]   ;;  %v1174_v5 = vld [vmem:[%s260_s27 + $0x8] sm:$0xff]   ;;  %305 = vperm.xlu1 %1069, %v290_v7  }
  0x12   : > { %989 = vmatprep.mubr.msk.bf16.mxu1 %vm331_vm2, %v1172_v4 }
  0x13   : > { %990 = vmatmul.mubr.msk.bf16.vlgmr.msra.gmra.mrb[0].mxu1 %vm331_vm2, %v1174_v5 }
  0x14   : > { %995 = vmatprep.mubr.msk.bf16.mxu1 %vm331_vm2, %v1172_v4  ;;  %300 = vperm.xlu0 %1068, %v289_v8  }
  0x15   : > { %310 = vperm.xlu1 %1069, %v291_v9   ;;  %994 = vmatpush3.bf16.msra.mxu1 %v452_v11 }
  0x16   : > { %1033 = vmatprep.subr.msk.bf16.mxu1 %vm338_vm0, %v951_v46  ;;  %v1078_v46 = vld [vmem:[%s1265_s3] sm:$0xff]  }
  0x17   : > { %1027 = vmatprep.mubr.bf16.mxu0 %v1078_v46 }
  0x18   : > { %1070 = vset.pattern.permute.xlu0 %v1106_v16 }
  0x19   : > { %1071 = vset.pattern.permute.xlu1 %v1106_v16 }
  0x1b   : > { %996 = vmatmul.mubr.msk.bf16.vlgmr.msra.gmra.mrb[4].mxu1 %vm331_vm2, %v1174_v5 }
  0x1c   : > { %1001 = vmatprep.mubr.msk.bf16.mxu1 %vm331_vm2, %v1172_v4  ;;  %1000 = vmatpush3.bf16.msra.mxu1 %v564_v47  ;;  %v956_v47 = vld [vmem:[%s1264_s2 + $0x3] ss:$0 sm:$0xff] }
  0x23   : > { %1002 = vmatmul.mubr.msk.bf16.vlgmr.msra.gmra.mrb[8].mxu1 %vm331_vm2, %v1174_v5 }
  0x24   : > { %1007 = vmatprep.mubr.msk.bf16.mxu1 %vm331_vm2, %v1172_v4 }
  0x8f   : > { %v296_v13 = vpop.permute.xlu0 %295 }
  0x90   : > { %v306_v12 = vpop.permute.xlu1 %305  ;;  %v317_v20 = vmul.f32 %v942_v14, %v296_v13 }
  0x91   : > { %v319_v17 = vmul.f32 %v942_v14, %v306_v12 }
  0x93   : > { %v301_v18 = vpop.permute.xlu0 %300 }
  0x94   : > { %v311_v15 = vpop.permute.xlu1 %310  ;;  %v318_v23 = vmul.f32 %v942_v14, %v301_v18  ;;  %v1110_v18 = vmov 3  }
  0x95   : > { %v320_v19 = vmul.f32 %v942_v14, %v311_v15  ;;  %v955_v15 = vld [vmem:[%s1263_s1 + $0xc] sm:$0xf] }
  0x96   : > { %1034 = vmatprep.subr.msk.bf16.mxu1 %vm338_vm0, %v955_v15  ;;  %v676_v16 = vsel %vm338_vm0, %v955_v15, 0 }
  0x97   : > { %1006 = vmatpush3.bf16.msra.mxu1 %v676_v16 }
  0x9a   : > { %1008 = vmatmul.mubr.msk.bf16.vlgmr.msra.gmra.mrb[12].mxu1 %vm331_vm2, %v1174_v5 }
  0xe6   : > { %v991_v21 = vpop.f32.mrb[0].mxu1 }
  0xe7   : > { %v376_v22 = vpop.f32.mrb[1].mxu1  ;;  %v385_v26 = vadd.f32 %v991_v21, %v319_v17  ;;  %v952_v17 = vld [vmem:[%s1264_s2 + $0x2] ss:$0 sm:$0xff] }
  0xe8   : > { %v377_v24 = vadd.f32 %v376_v22, %v317_v20  ;;  %v992_v25 = vpop.f32.mrb[2].mxu1 }
  0xe9   : > { %v388_v27 = vadd.f32 %v992_v25, %v320_v19  ;;  %v379_v28 = vpop.f32.mrb[3].mxu1 }
  0xea   : > { %v380_v29 = vadd.f32 %v379_v28, %v318_v23  ;;  %395 = vrot.lane.b32.xlu0 %v377_v24, %s1107_s7 }
  0xeb   : > { %v413_v30 = vpack.c.bf16 %v388_v27, %v385_v26 }
  0xec   : > { %v412_v31 = vpack.c.bf16 %v380_v29, %v377_v24  ;;  %397 = vrot.lane.b32.xlu1 %v380_v29, %s1107_s7 }
  0xed   : > { %415 = vst.msk [vmem:[#allocation2 + $0x8] sm:$0xff] %vm331_vm2, %v413_v30 }
  0xee   : > { %414 = vst.msk [vmem:[#allocation2] sm:$0xff] %vm331_vm2, %v412_v31  ;;  %399 = vrot.lane.b32.xlu0 %v385_v26, %s1107_s7  ;;  %v997_v34 = vpop.f32.mrb[4].mxu1 }
  0xef   : > { %v488_v40 = vpop.f32.mrb[5].mxu1 }
  0xf0   : > { %401 = vrot.lane.b32.xlu1 %v388_v27, %s1107_s7  ;;  %v998_v42 = vpop.f32.mrb[6].mxu1 }
  0xf1   : > { %v491_v43 = vpop.f32.mrb[7].mxu1 }
  0xf4   : > { %v761_v33 = vld [vmem:[#allocation2 + $0x8] sm:$0xff] }
  0xf5   : > { %v760_v32 = vld [vmem:[#allocation2] sm:$0xff] }
  0xf6   : > { %1011 = vmatprep.subr.bf16.mxu0 %v760_v32  ;;  %v1003_v8 = vpop.f32.mrb[8].mxu1 }
  0xf7   : > { %1012 = vmatpush3.bf16.msra.mxu0 %v760_v32  ;;  %v600_v10 = vpop.f32.mrb[9].mxu1 }
  0xf8   : > { %1013 = vmatprep.subr.bf16.mxu0 %v761_v33  ;;  %v1004_v11 = vpop.f32.mrb[10].mxu1 }
  0xf9   : > { %v603_v12 = vpop.f32.mrb[11].mxu1 }
  0xfb   : > { %1014 = vmatpush3.bf16.msra.mxu0 %v761_v33 }
 0x15c   : > { %v396_v35 = vpop.permute.xlu0 %395 }
 0x15d   : > { %408 = vst.msk [vmem:[#allocation3] sm:$0xff] %vm407_vm3, %v396_v35 }
 0x15e   : > { %v398_v36 = vpop.permute.xlu1 %397 }
 0x15f   : > { %409 = vst.msk [vmem:[#allocation3 + $0x8] sm:$0xff] %vm407_vm3, %v398_v36 }
 0x160   : > { %v400_v37 = vpop.permute.xlu0 %399 }
 0x161   : > { %410 = vst.msk [vmem:[#allocation3 + $0x10] sm:$0xff] %vm407_vm3, %v400_v37 }
 0x162   : > { %v402_v38 = vpop.permute.xlu1 %401 }
 0x163   : > { %411 = vst.msk [vmem:[#allocation3 + $0x18] sm:$0xff] %vm407_vm3, %v402_v38 }
 0x164   : > { %v418_v39 = vld [vmem:[#allocation3] sm:$0xff] }
 0x165   : > { %425 = vperm.xlu0 %1070, %v418_v39  }
 0x166   : > { %v419_v41 = vld [vmem:[#allocation3 + $0x8] sm:$0xff] }
 0x167   : > { %430 = vperm.xlu1 %1071, %v419_v41  }
 0x168   : > { %v420_v45 = vld [vmem:[#allocation3 + $0x10] sm:$0xff] }
 0x16a   : > { %v421_v44 = vld [vmem:[#allocation3 + $0x18] sm:$0xff] }
 0x16b   : > { %440 = vperm.xlu0 %1070, %v421_v44   ;;  %435 = vperm.xlu1 %1071, %v420_v45  }
 0x16d   : > { %v1009_v38 = vpop.f32.mrb[12].mxu1 }
 0x16e   : > { %v712_v41 = vpop.f32.mrb[13].mxu1 }
 0x16f   : > { %1072 = vset.pattern.permute.xlu1 %v1108_v49  ;;  %1073 = vset.pattern.permute.xlu0 %v1108_v49 }
 0x1e4   : > { %v426_v50 = vpop.permute.xlu0 %425 }
 0x1e5   : > { %v447_v51 = vmul.f32 %v948_v48, %v426_v50 }
 0x1e6   : > { %v431_v52 = vpop.permute.xlu1 %430 }
 0x1e7   : > { %v489_v53 = vadd.f32 %v488_v40, %v447_v51  ;;  %v448_v54 = vmul.f32 %v948_v48, %v431_v52 }
 0x1e9   : > { %v492_v55 = vadd.f32 %v491_v43, %v448_v54  ;;  %507 = vrot.lane.b32.xlu1 %v489_v53, %s1109_s12 }
 0x1ea   : > { %v436_v56 = vpop.permute.xlu1 %435  ;;  %v441_v57 = vpop.permute.xlu0 %440 }
 0x1eb   : > { %v524_v58 = vpack.c.bf16 %v492_v55, %v489_v53  ;;  %v449_v59 = vmul.f32 %v948_v48, %v436_v56  ;;  %v450_v60 = vmul.f32 %v948_v48, %v441_v57  ;;  %509 = vrot.lane.b32.xlu0 %v492_v55, %s1109_s12 }
 0x1ed   : > { %526 = vst.msk [vmem:[#allocation2 + $0x10] sm:$0xff] %vm331_vm2, %v524_v58  ;;  %v497_v61 = vadd.f32 %v997_v34, %v449_v59  ;;  %v500_v62 = vadd.f32 %v998_v42, %v450_v60  ;;  %v1010_v42 = vpop.f32.mrb[14].mxu1 }
 0x1ee   : > { %v715_v43 = vpop.f32.mrb[15].mxu1 }
 0x1ef   : > { %v525_v63 = vpack.c.bf16 %v500_v62, %v497_v61  ;;  %511 = vrot.lane.b32.xlu1 %v497_v61, %s1109_s12  ;;  %513 = vrot.lane.b32.xlu0 %v500_v62, %s1109_s12 }
 0x1f1   : > { %527 = vst.msk [vmem:[#allocation2 + $0x18] sm:$0xff] %vm331_vm2, %v525_v63 }
 0x1f4   : > { %v762_v0 = vld [vmem:[#allocation2 + $0x10] sm:$0xff] }
 0x1f5   : > { %1015 = vmatprep.subr.bf16.mxu0 %v762_v0 }
 0x1f6   : > { %1016 = vmatpush3.bf16.msra.mxu0 %v762_v0  ;;  %v1079_v0 = vld [vmem:[%s1265_s3 + $0x8] sm:$0xff]  }
 0x1f8   : > { %v763_v1 = vld [vmem:[#allocation2 + $0x18] sm:$0xff] }
 0x1f9   : > { %1017 = vmatprep.subr.bf16.mxu0 %v763_v1 }
 0x1fa   : > { %1018 = vmatpush3.bf16.msra.mxu0 %v763_v1 }
 0x25b   : > { %v508_v2 = vpop.permute.xlu1 %507 }
 0x25c   : > { %520 = vst.msk [vmem:[#allocation3] sm:$0xff] %vm519_vm4, %v508_v2 }
 0x25d   : > { %v510_v3 = vpop.permute.xlu0 %509 }
 0x25e   : > { %521 = vst.msk [vmem:[#allocation3 + $0x8] sm:$0xff] %vm519_vm4, %v510_v3 }
 0x261   : > { %v512_v4 = vpop.permute.xlu1 %511  ;;  %v514_v6 = vpop.permute.xlu0 %513 }
 0x262   : > { %522 = vst.msk [vmem:[#allocation3 + $0x10] sm:$0xff] %vm519_vm4, %v512_v4  ;;  %523 = vst.msk [vmem:[#allocation3 + $0x18] sm:$0xff] %vm519_vm4, %v514_v6  ;;  %v754_v6 = vld [vmem:[%s1266_s4 + $0x10] sm:$0xff] }
 0x263   : > { %v530_v7 = vld [vmem:[#allocation3] sm:$0xff] }
 0x264   : > { %537 = vperm.xlu1 %1072, %v530_v7   ;;  %v752_v7 = vld [vmem:[%s1266_s4] sm:$0xff] }
 0x265   : > { %v531_v9 = vld [vmem:[#allocation3 + $0x8] sm:$0xff] }
 0x266   : > { %542 = vperm.xlu0 %1073, %v531_v9   ;;  %v755_v9 = vld [vmem:[%s1266_s4 + $0x18] sm:$0xff] }
 0x269   : > { %v532_v13 = vld [vmem:[#allocation3 + $0x10] sm:$0xff]  ;;  %v533_v14 = vld [vmem:[#allocation3 + $0x18] sm:$0xff] }
 0x26a   : > { %547 = vperm.xlu1 %1072, %v532_v13   ;;  %1074 = vset.pattern.permute.xlu0 %v1110_v18 }
 0x26e   : > { %552 = vperm.xlu1 %1072, %v533_v14  }
 0x272   : > { %1075 = vset.pattern.permute.xlu1 %v1110_v18 }
 0x2e3   : > { %v538_v19 = vpop.permute.xlu1 %537 }
 0x2e4   : > { %v559_v20 = vmul.f32 %v952_v17, %v538_v19 }
 0x2e5   : > { %v543_v21 = vpop.permute.xlu0 %542 }
 0x2e6   : > { %v601_v22 = vadd.f32 %v600_v10, %v559_v20  ;;  %v560_v23 = vmul.f32 %v952_v17, %v543_v21 }
 0x2e8   : > { %v604_v24 = vadd.f32 %v603_v12, %v560_v23  ;;  %619 = vrot.lane.b32.xlu0 %v601_v22, %s1111_s17  ;;  %v753_v12 = vld [vmem:[%s1266_s4 + $0x8] sm:$0xff] }
 0x2e9   : > { %v548_v25 = vpop.permute.xlu1 %547 }
 0x2ea   : > { %v636_v26 = vpack.c.bf16 %v604_v24, %v601_v22  ;;  %v561_v27 = vmul.f32 %v952_v17, %v548_v25  ;;  %621 = vrot.lane.b32.xlu1 %v604_v24, %s1111_s17 }
 0x2ec   : > { %638 = vst.msk [vmem:[#allocation2 + $0x20] sm:$0xff] %vm331_vm2, %v636_v26  ;;  %v609_v5 = vadd.f32 %v1003_v8, %v561_v27 }
 0x2ed   : > { %v553_v28 = vpop.permute.xlu1 %552 }
 0x2ee   : > { %v562_v29 = vmul.f32 %v952_v17, %v553_v28  ;;  %623 = vrot.lane.b32.xlu0 %v609_v5, %s1111_s17 }
 0x2f0   : > { %v612_v30 = vadd.f32 %v1004_v11, %v562_v29 }
 0x2f2   : > { %v637_v31 = vpack.c.bf16 %v612_v30, %v609_v5  ;;  %625 = vrot.lane.b32.xlu1 %v612_v30, %s1111_s17 }
 0x2f3   : > { %v764_v32 = vld [vmem:[#allocation2 + $0x20] sm:$0xff] }
 0x2f4   : > { %639 = vst.msk [vmem:[#allocation2 + $0x28] sm:$0xff] %vm331_vm2, %v637_v31  ;;  %1019 = vmatprep.subr.bf16.mxu0 %v764_v32 }
 0x2f5   : > { %1020 = vmatpush3.bf16.msra.mxu0 %v764_v32 }
 0x2fb   : > { %v765_v33 = vld [vmem:[#allocation2 + $0x28] sm:$0xff] }
 0x2fc   : > { %1021 = vmatprep.subr.bf16.mxu0 %v765_v33 }
 0x2fd   : > { %1022 = vmatpush3.bf16.msra.mxu0 %v765_v33 }
 0x35a   : > { %v620_v34 = vpop.permute.xlu0 %619 }
 0x35b   : > { %632 = vst.msk [vmem:[#allocation3] sm:$0xff] %vm631_vm5, %v620_v34 }
 0x35c   : > { %v622_v35 = vpop.permute.xlu1 %621 }
 0x35d   : > { %633 = vst.msk [vmem:[#allocation3 + $0x8] sm:$0xff] %vm631_vm5, %v622_v35 }
 0x360   : > { %v624_v36 = vpop.permute.xlu0 %623 }
 0x361   : > { %634 = vst.msk [vmem:[#allocation3 + $0x10] sm:$0xff] %vm631_vm5, %v624_v36 }
 0x362   : > { %v642_v37 = vld [vmem:[#allocation3] sm:$0xff] }
 0x363   : > { %649 = vperm.xlu0 %1074, %v642_v37  }
 0x364   : > { %v626_v39 = vpop.permute.xlu1 %625  ;;  %v643_v40 = vld [vmem:[#allocation3 + $0x8] sm:$0xff] }
 0x365   : > { %635 = vst.msk [vmem:[#allocation3 + $0x18] sm:$0xff] %vm631_vm5, %v626_v39  ;;  %654 = vperm.xlu1 %1075, %v643_v40  }
 0x368   : > { %v644_v44 = vld [vmem:[#allocation3 + $0x10] sm:$0xff] }
 0x369   : > { %659 = vperm.xlu1 %1075, %v644_v44  }
 0x36c   : > { %v645_v45 = vld [vmem:[#allocation3 + $0x18] sm:$0xff] }
 0x36d   : > { %664 = vperm.xlu0 %1074, %v645_v45  }
 0x3e2   : > { %v650_v48 = vpop.permute.xlu0 %649 }
 0x3e3   : > { %v671_v49 = vmul.f32 %v956_v47, %v650_v48 }
 0x3e4   : > { %v655_v50 = vpop.permute.xlu1 %654 }
 0x3e5   : > { %v713_v51 = vadd.f32 %v712_v41, %v671_v49  ;;  %v672_v52 = vmul.f32 %v956_v47, %v655_v50 }
 0x3e7   : > { %v716_v53 = vadd.f32 %v715_v43, %v672_v52  ;;  %731 = vrot.lane.b32.xlu1 %v713_v51, %s1112_s26 }
 0x3e8   : > { %v660_v54 = vpop.permute.xlu1 %659 }
 0x3e9   : > { %v748_v55 = vpack.c.bf16 %v716_v53, %v713_v51  ;;  %v673_v56 = vmul.f32 %v956_v47, %v660_v54  ;;  %733 = vrot.lane.b32.xlu0 %v716_v53, %s1112_s26 }
 0x3eb   : > { %750 = vst.msk [vmem:[#allocation2 + $0x30] sm:$0xff] %vm331_vm2, %v748_v55  ;;  %v721_v57 = vadd.f32 %v1009_v38, %v673_v56 }
 0x3ec   : > { %v665_v58 = vpop.permute.xlu0 %664 }
 0x3ed   : > { %v674_v59 = vmul.f32 %v956_v47, %v665_v58  ;;  %735 = vrot.lane.b32.xlu1 %v721_v57, %s1112_s26 }
 0x3ef   : > { %v724_v60 = vadd.f32 %v1010_v42, %v674_v59 }
 0x3f1   : > { %v749_v61 = vpack.c.bf16 %v724_v60, %v721_v57  ;;  %737 = vrot.lane.b32.xlu0 %v724_v60, %s1112_s26 }
 0x3f2   : > { %v766_v62 = vld [vmem:[#allocation2 + $0x30] sm:$0xff] }
 0x3f3   : > { %751 = vst.msk [vmem:[#allocation2 + $0x38] sm:$0xff] %vm331_vm2, %v749_v61  ;;  %1023 = vmatprep.subr.bf16.mxu0 %v766_v62 }
 0x3f4   : > { %1024 = vmatpush3.bf16.msra.mxu0 %v766_v62 }
 0x3fa   : > { %v767_v63 = vld [vmem:[#allocation2 + $0x38] sm:$0xff] }
 0x3fb   : > { %1025 = vmatprep.subr.bf16.mxu0 %v767_v63 }
 0x3fc   : > { %1026 = vmatpush3.bf16.msra.mxu0 %v767_v63 }
 0x3ff   : > { %1028 = vmatmul.mubr.bf16.vlgmr.msra.gmra.mrb[0].mxu0 %v1079_v0 }
 0x459   : > { %v732_v1 = vpop.permute.xlu1 %731 }
 0x45a   : > { %744 = vst.msk [vmem:[#allocation3] sm:$0xff] %vm743_vm6, %v732_v1 }
 0x45b   : > { %v734_v2 = vpop.permute.xlu0 %733 }
 0x45c   : > { %745 = vst.msk [vmem:[#allocation3 + $0x8] sm:$0xff] %vm743_vm6, %v734_v2 }
 0x45f   : > { %v736_v3 = vpop.permute.xlu1 %735 }
 0x460   : > { %746 = vst.msk [vmem:[#allocation3 + $0x10] sm:$0xff] %vm743_vm6, %v736_v3 }
 0x463   : > { %v738_v4 = vpop.permute.xlu0 %737 }
 0x464   : > { %747 = vst.msk [vmem:[#allocation3 + $0x18] sm:$0xff] %vm743_vm6, %v738_v4 }
 0x4d2   : > { %v1029_v8 = vpop.f32.mrb[0].mxu0 }
 0x4d3   : > { %v823_v10 = vadd.f32 %v1029_v8, %v754_v6  ;;  %v814_v11 = vpop.f32.mrb[1].mxu0 }
 0x4d4   : > { %v815_v13 = vadd.f32 %v814_v11, %v752_v7  ;;  %v1030_v14 = vpop.f32.mrb[2].mxu0 }
 0x4d5   : > { %831 = vst.msk [vmem:[%s272_s11 + $0x10] sm:$0xff] %vm331_vm2, %v823_v10  ;;  %v826_v15 = vadd.f32 %v1030_v14, %v755_v9  ;;  %v817_v16 = vpop.f32.mrb[3].mxu0 }
 0x4d6   : > { %829 = vst.msk [vmem:[%s272_s11] sm:$0xff] %vm331_vm2, %v815_v13  ;;  %v818_v17 = vadd.f32 %v817_v16, %v753_v12 }
 0x4d7   : > { %832 = vst.msk [vmem:[%s272_s11 + $0x18] sm:$0xff] %vm331_vm2, %v826_v15 }
 0x4d8   : > { %830 = vst.msk [vmem:[%s272_s11 + $0x8] sm:$0xff] %vm331_vm2, %v818_v17 }
 0x4d9 PF: > { %s15_s20 = sadd.s32 1, %s1102_s20   ;;  %s1268_s18 = smov %s1098_s19 }
 0x4da   : > { %p12_p5 = scmp.ge.s32.totalorder %s15_s20, 4   ;;  %s1269_s19 = smov %s1271_s21 }
 0x4dc   :  { %14 = sbr.rel (!%p12_p5) target bundleno = 2 (0x2), region = 80 }

</bundles_post_ra>
